<compile_context>
chip_gen: v6e
topology: v6e:2x2x1
jax: 0.10.0
libtpu: 0.0.40
codegen_flags: <defaults>
</compile_context>

<pallas_src>
import functools
import numpy as np
import jax
import jax.numpy as jnp
from jax.experimental import pallas as pl
from jax.experimental.pallas import tpu as pltpu


# ----------------------------------------------------------------------------- utils
def round_up(x, m):
    return ((x + m - 1) // m) * m


def _vmem_cap_bytes():
    try:
        return int(pltpu.get_tpu_info().vmem_capacity_bytes)
    except Exception:
        return 64 * 1024 * 1024  # conservative: v7x physical VMEM per TensorCore


_VMEM_CAP = _vmem_cap_bytes()


# ------------------------------------------------------------------ fused matmul kernel
def _matmul_kernel(a_ref, w_ref, s_ref, t_ref, o_ref, *, act):
    k = pl.program_id(2)

    @pl.when(k == 0)
    def _():
        o_ref[...] = jnp.zeros_like(o_ref)

    # bf16 operands, f32 accumulation directly into the resident output block.
    o_ref[...] += jnp.dot(a_ref[...], w_ref[...], preferred_element_type=jnp.float32)

    @pl.when(k == pl.num_programs(2) - 1)
    def _():
        y = o_ref[...] * s_ref[...] + t_ref[...]
        if act == "relu":
            y = jnp.maximum(y, 0.0)
        elif act == "sigmoid":
            y = jax.nn.sigmoid(y)
        o_ref[...] = y


def fused_matmul(A, p, act="none"):
    """y = act((A @ W) * scale + shift) with prepared/padded bf16 weights in p."""
    M, K = A.shape
    Kp, Np = p["w"].shape
    N = p["N"]
    assert K == p["K"]

    if M <= 256:
        Mp = round_up(max(M, 16), 16)   # bf16 sublane packing
        tm = Mp
    else:
        tm = 256
        Mp = round_up(M, tm)
    tk = 512 if Kp % 512 == 0 else (256 if Kp % 256 == 0 else 128)
    tn = 256 if Np % 256 == 0 else 128

    # Always present the grid a fully padded (Mp, Kp) activation slab: every block
    # read is in-bounds, so padded lanes are exact zeros (0 * W_pad = 0).
    if (M, K) == (Mp, Kp):
        Ap = A.astype(jnp.bfloat16)
    else:
        Ap = jnp.zeros((Mp, Kp), jnp.bfloat16).at[:M, :K].set(A.astype(jnp.bfloat16))

    # VMEM budget from the actual double-buffered tile footprint, capped per generation.
    block_bytes = 2 * (tm * tk * 2 + tk * tn * 2 + 2 * tn * 4 + tm * tn * 4)
    vmem_limit = int(min(_VMEM_CAP * 0.85, max(block_bytes + (8 << 20), 32 << 20)))

    grid = (Mp // tm, Np // tn, Kp // tk)
    out = pl.pallas_call(
        functools.partial(_matmul_kernel, act=act),
        out_shape=jax.ShapeDtypeStruct((Mp, Np), jnp.float32),
        grid_spec=pltpu.PrefetchScalarGridSpec(
            num_scalar_prefetch=0,
            grid=grid,
            in_specs=[
                pl.BlockSpec((tm, tk), lambda i, j, k: (i, k)),
                pl.BlockSpec((tk, tn), lambda i, j, k: (k, j)),
                pl.BlockSpec((1, tn), lambda i, j, k: (0, j)),
                pl.BlockSpec((1, tn), lambda i, j, k: (0, j)),
            ],
            out_specs=pl.BlockSpec((tm, tn), lambda i, j, k: (i, j)),
        ),
        compiler_params=pltpu.CompilerParams(
            dimension_semantics=("parallel", "parallel", "arbitrary"),
            vmem_limit_bytes=vmem_limit,
        ),
    )(Ap, p["w"], p["s"], p["t"])
    return out[:M, :N]


# ------------------------------------------------------------- matvec (N=1 heads) kernel
def _matvec_kernel(a_ref, w_ref, b_ref, o_ref, *, act):
    y = jnp.sum(a_ref[...] * w_ref[...], axis=-1, keepdims=True) + b_ref[...]
    if act == "relu":
        y = jnp.maximum(y, 0.0)
    elif act == "sigmoid":
        y = jax.nn.sigmoid(y)
    o_ref[...] = y


def pallas_matvec(A, p, act="none"):
    """A:(M,K) @ w:(K,1) + b via VPU multiply + lane reduce (no MXU lane padding)."""
    M, K = A.shape
    if M <= 512:
        Mp = round_up(max(M, 8), 8)
        tm = Mp
    else:
        tm = 256
        Mp = round_up(M, tm)
    if M == Mp:
        Ap = A.astype(jnp.float32)
    else:
        Ap = jnp.zeros((Mp, K), jnp.float32).at[:M, :].set(A.astype(jnp.float32))

    out = pl.pallas_call(
        functools.partial(_matvec_kernel, act=act),
        out_shape=jax.ShapeDtypeStruct((Mp, 1), jnp.float32),
        grid_spec=pltpu.PrefetchScalarGridSpec(
            num_scalar_prefetch=0,
            grid=(Mp // tm,),
            in_specs=[
                pl.BlockSpec((tm, K), lambda i: (i, 0)),
                pl.BlockSpec((1, K), lambda i: (0, 0)),
                pl.BlockSpec((1, 1), lambda i: (0, 0)),
            ],
            out_specs=pl.BlockSpec((tm, 1), lambda i: (i, 0)),
        ),
        compiler_params=pltpu.CompilerParams(dimension_semantics=("parallel",)),
    )(Ap, p["w"], p["b"])
    return out[:M]


# -------------------------------------------------------------- elementwise gating kernel
def _mul_kernel(a_ref, b_ref, o_ref, *, sigmoid_b):
    b = b_ref[...]
    if sigmoid_b:
        b = jax.nn.sigmoid(b)
    o_ref[...] = a_ref[...] * b


def pallas_mul(a, b, sigmoid_b=False):
    """a:(M,C) * b:(M,C) or (M,1) (broadcast over channels / lanes)."""
    return pl.pallas_call(
        functools.partial(_mul_kernel, sigmoid_b=sigmoid_b),
        out_shape=jax.ShapeDtypeStruct(a.shape, a.dtype),
    )(a, b)


# ----------------------------------------------------- channel-attention scaling kernel
def _scale_ch_kernel(x_ref, ca_ref, o_ref):
    # (B, HW, C) * (B, 1, C) — broadcast done inside the kernel (no HBM broadcast).
    o_ref[...] = x_ref[...] * ca_ref[...]


def pallas_scale_channels(x, ca):
    B, HW, C = x.shape
    return pl.pallas_call(
        _scale_ch_kernel,
        out_shape=jax.ShapeDtypeStruct((B, HW, C), x.dtype),
    )(x, ca.reshape(B, 1, C))


# ------------------------------------------------------------------ CBAM pooling kernel
def _pool_kernel(x_ref, avg_ref, max_ref):
    x = x_ref[...]                       # (B, HW, C)
    avg_ref[...] = jnp.mean(x, axis=1)
    max_ref[...] = jnp.max(x, axis=1)


def pallas_pool(x):
    B, HW, C = x.shape
    return pl.pallas_call(
        _pool_kernel,
        out_shape=(jax.ShapeDtypeStruct((B, C), x.dtype),
                   jax.ShapeDtypeStruct((B, C), x.dtype)),
    )(x)


# --------------------------------------------------------------------------- conv glue
def im2col(x, kh, kw, pad, dil=1):
    """x: NHWC, stride 1. Returns (B, Ho, Wo, kh*kw*C), patch order (kh, kw, C)."""
    B, H, W, C = x.shape
    xp = jnp.pad(x, ((0, 0), (pad, pad), (pad, pad), (0, 0)))
    Ho = H + 2 * pad - dil * (kh - 1)
    Wo = W + 2 * pad - dil * (kw - 1)
    cols = []
    for i in range(kh):
        for j in range(kw):
            cols.append(xp[:, i * dil:i * dil + Ho, j * dil:j * dil + Wo, :])
    return jnp.concatenate(cols, axis=-1)


def apply_conv(x, p, pad=0, dil=1, act="none"):
    """Conv with prepared weights; BN/bias folded. Dispatches N=1 heads to matvec."""
    B = x.shape[0]
    if p["kh"] == 1 and p["kw"] == 1:
        patches = x
    else:
        patches = im2col(x, p["kh"], p["kw"], pad, dil)
    _, Ho, Wo, K = patches.shape
    flat = patches.reshape(-1, K)
    if p.get("mv", False):
        y = pallas_matvec(flat, p, act)
    else:
        y = fused_matmul(flat, p, act)
    return y.reshape(B, Ho, Wo, -1)


def conv_transpose_up(x, phases):
    """ConvTranspose2d(k=4, s=2, p=1)+BN+ReLU via sub-pixel decomposition:
    four 2x2 convs (one per output phase), results interleaved to 2H x 2W."""
    B, H, W, C = x.shape
    rows = []
    for ry in range(2):
        cols = []
        for rx in range(2):
            p = phases[2 * ry + rx]
            xp = jnp.pad(x, ((0, 0), (1 - ry, ry), (1 - rx, rx), (0, 0)))
            patches = jnp.concatenate(
                [xp[:, i:i + H, j:j + W, :] for i in range(2) for j in range(2)],
                axis=-1)                                     # (B, H, W, 4C)
            y = fused_matmul(patches.reshape(-1, 4 * C), p, act="relu")
            cols.append(y.reshape(B, H, W, -1))
        rows.append(jnp.stack(cols, axis=3))                 # (B, H, W, 2, Cout)
    grid = jnp.stack(rows, axis=2)                           # (B, H, 2, W, 2, Cout)
    Cout = grid.shape[-1]
    return grid.reshape(B, 2 * H, 2 * W, Cout)


def interp_matrix(out_size, in_size):
    """align_corners=True bilinear interpolation matrix (out_size, in_size)."""
    if in_size == 1:
        return jnp.ones((out_size, 1), jnp.float32)
    y = np.arange(out_size, dtype=np.float64)
    src = y * (in_size - 1) / max(out_size - 1, 1)
    i0 = np.clip(np.floor(src).astype(np.int64), 0, in_size - 1)
    i1 = np.clip(i0 + 1, 0, in_size - 1)
    w1 = (src - i0).astype(np.float32)
    w0 = 1.0 - w1
    R = np.zeros((out_size, in_size), np.float32)
    R[np.arange(out_size), i0] += w0
    R[np.arange(out_size), i1] += w1
    return jnp.asarray(R)


def bilinear_align(x, out_hw):
    """(B,H,W,1) -> (B,Ho,Wo,1), align_corners=True. Tiny matrices -> plain XLA."""
    B, H, W, _ = x.shape
    Rh = interp_matrix(out_hw[0], H)
    Rw = interp_matrix(out_hw[1], W)
    return jnp.einsum("oh,bhwc,pw->bopc", Rh, x, Rw)


# ---------------------------------------------------------------------------- params
class ParamGen:
    def __init__(self, seed=0):
        self.key = jax.random.PRNGKey(seed)
        self.i = 0

    def take(self, shape, scale=1.0):
        self.i += 1
        k = jax.random.fold_in(self.key, self.i)
        return (jax.random.normal(k, shape) * scale).astype(jnp.float32)


def prep_conv(w, scale, shift, kh, kw):
    """Pad + cast weights once at parameter-prep time (bf16 W, f32 scale/shift)."""
    K, N = w.shape
    Kp, Np = round_up(K, 128), round_up(N, 128)
    if (K, N) == (Kp, Np):
        wp = w.astype(jnp.bfloat16)
        sp = scale.reshape(1, N).astype(jnp.float32)
        tp = shift.reshape(1, N).astype(jnp.float32)
    else:
        wp = jnp.zeros((Kp, Np), jnp.bfloat16).at[:K, :N].set(w.astype(jnp.bfloat16))
        sp = jnp.zeros((1, Np), jnp.float32).at[0, :N].set(scale.astype(jnp.float32))
        tp = jnp.zeros((1, Np), jnp.float32).at[0, :N].set(shift.astype(jnp.float32))
    return dict(w=wp, s=sp, t=tp, K=K, N=N, kh=kh, kw=kw)


def conv_p(pg, kh, kw, cin, cout, bn=True):
    K = kh * kw * cin
    w = pg.take((K, cout), 1.0 / np.sqrt(K))
    if bn:
        s = 1.0 + 0.1 * pg.take((cout,))
        t = 0.1 * pg.take((cout,))
    else:
        s = jnp.ones((cout,), jnp.float32)
        t = 0.1 * pg.take((cout,))
    return prep_conv(w, s, t, kh, kw)


def matvec_p(pg, kh, kw, cin):
    K = kh * kw * cin
    w = pg.take((K, 1), 1.0 / np.sqrt(K))
    b = 0.1 * pg.take((1,))
    return dict(mv=True, w=w.reshape(1, K).astype(jnp.float32),
                b=b.reshape(1, 1).astype(jnp.float32), kh=kh, kw=kw)


def up_params(pg, cin, cout):
    """Four 2x2 phase convs sharing BN scale/shift (sub-pixel transposed conv)."""
    s = 1.0 + 0.1 * pg.take((cout,))
    t = 0.1 * pg.take((cout,))
    K = 4 * cin
    return [prep_conv(pg.take((K, cout), 1.0 / np.sqrt(K)), s, t, 2, 2)
            for _ in range(4)]


def cbam_params(pg, C):
    r = max(C // 16, 1)
    return dict(
        w1=pg.take((C, r), 1.0 / np.sqrt(C)),
        w2=pg.take((r, C), 1.0 / np.sqrt(r)),
        b2=0.1 * pg.take((C,)),
        spatial=matvec_p(pg, 7, 7, 2),
    )


def level_params(pg, planes):
    q = planes // 4
    return dict(
        contrast=dict(
            reduce=conv_p(pg, 1, 1, planes, q),
            local=conv_p(pg, 3, 3, q, q),
            ctx=conv_p(pg, 3, 3, q, q),
            expand=conv_p(pg, 1, 1, q, planes),
        ),
        ra=dict(
            q=conv_p(pg, 1, 1, planes, planes // 8),
            out=conv_p(pg, 1, 1, planes // 8, planes, bn=False),
        ),
        up=up_params(pg, planes, planes // 4),
        cbam=cbam_params(pg, planes // 4),
        predict=matvec_p(pg, 3, 3, planes // 4),
    )


def build_params(seed=0):
    pg = ParamGen(seed)
    return dict(
        l4=level_params(pg, 2048),
        l3=level_params(pg, 1024),
        l2=level_params(pg, 512),
        l1=level_params(pg, 256),
        refine=matvec_p(pg, 1, 1, 4),
    )


# --------------------------------------------------------------------------- modules
def contrast_module(x, prm, d1):
    q = apply_conv(x, prm["reduce"], pad=0, act="relu")
    loc = apply_conv(q, prm["local"], pad=1)
    ctx = apply_conv(q, prm["ctx"], pad=d1, dil=d1)
    diff = jnp.maximum(loc - ctx, 0.0)                      # tiny elementwise glue
    return apply_conv(diff, prm["expand"], pad=0, act="relu")


def relation_attention(x, prm):
    h = apply_conv(x, prm["q"], pad=0, act="relu")
    return apply_conv(h, prm["out"], pad=0, act="sigmoid")  # attention map, same channels


def cbam(x, prm):
    B, H, W, C = x.shape
    avg, mx = pallas_pool(x.reshape(B, H * W, C))           # (B, C) each
    # tiny (B=2)-row shared-weight channel MLP: plain XLA beats padded MXU tiles
    h_avg = jnp.maximum(avg @ prm["w1"], 0.0)
    h_max = jnp.maximum(mx @ prm["w1"], 0.0)
    ca = jax.nn.sigmoid((h_avg @ prm["w2"] + prm["b2"]) + (h_max @ prm["w2"] + prm["b2"]))
    x_ca = pallas_scale_channels(x.reshape(B, H * W, C), ca).reshape(B, H, W, C)
    # spatial attention: channel-dim mean/max done as (small) JAX glue
    sa_in = jnp.concatenate(
        [jnp.mean(x_ca, axis=-1, keepdims=True), jnp.max(x_ca, axis=-1, keepdims=True)],
        axis=-1)
    sa = apply_conv(sa_in, prm["spatial"], pad=3, act="sigmoid")   # (B,H,W,1) via matvec
    out = pallas_mul(x_ca.reshape(-1, C), sa.reshape(-1, 1)).reshape(B, H, W, C)
    return out


def rccl_level(x, prm, d1):
    B, H, W, C = x.shape
    contrast = contrast_module(x, prm["contrast"], d1)
    att = relation_attention(x, prm["ra"])
    fc = pallas_mul(contrast.reshape(-1, C), att.reshape(-1, C)).reshape(B, H, W, C)
    up = conv_transpose_up(fc, prm["up"])
    cb = cbam(up, prm["cbam"])
    pred = apply_conv(cb, prm["predict"], pad=1)             # logits, 1 channel
    return pred, cb


def rccl_subnet_forward(feat_maps_nchw, params, origin_size=(32, 32)):
    # boundary: NCHW (PyTorch) -> NHWC (kernel layout)
    layer4, layer3, layer2, layer1 = [f.transpose(0, 2, 3, 1) for f in feat_maps_nchw]

    p4, cbam_4 = rccl_level(layer4, params["l4"], d1=2)
    g3 = pallas_mul(layer3.reshape(-1, layer3.shape[-1]), p4.reshape(-1, 1),
                    sigmoid_b=True).reshape(layer3.shape)
    p3, _ = rccl_level(g3, params["l3"], d1=4)
    g2 = pallas_mul(layer2.reshape(-1, layer2.shape[-1]), p3.reshape(-1, 1),
                    sigmoid_b=True).reshape(layer2.shape)
    p2, _ = rccl_level(g2, params["l2"], d1=4)
    g1 = pallas_mul(layer1.reshape(-1, layer1.shape[-1]), p2.reshape(-1, 1),
                    sigmoid_b=True).reshape(layer1.shape)
    p1, _ = rccl_level(g1, params["l1"], d1=4)

    p4u = bilinear_align(p4, origin_size)
    p3u = bilinear_align(p3, origin_size)
    p2u = bilinear_align(p2, origin_size)
    p1u = bilinear_align(p1, origin_size)

    cat = jnp.concatenate([p4u, p3u, p2u, p1u], axis=-1)     # (B, Ho, Wo, 4)
    refine = apply_conv(cat, params["refine"], pad=0)        # (B, Ho, Wo, 1)

    to_nchw = lambda t: t.transpose(0, 3, 1, 2)
    return (to_nchw(p4u), to_nchw(p3u), to_nchw(p2u), to_nchw(p1u),
            to_nchw(refine), to_nchw(cbam_4))


# ------------------------------------------------------------------------------ main
if __name__ == "__main__":
    key = jax.random.PRNGKey(0)
    B = 2
    # small feature pyramid consistent with the module's hard-coded channel counts
    layer4 = jax.random.normal(jax.random.fold_in(key, 101), (B, 2048, 2, 2), jnp.float32)
    layer3 = jax.random.normal(jax.random.fold_in(key, 102), (B, 1024, 4, 4), jnp.float32)
    layer2 = jax.random.normal(jax.random.fold_in(key, 103), (B, 512, 8, 8), jnp.float32)
    layer1 = jax.random.normal(jax.random.fold_in(key, 104), (B, 256, 16, 16), jnp.float32)

    params = build_params(seed=0)
    outs = rccl_subnet_forward((layer4, layer3, layer2, layer1), params, origin_size=(32, 32))
    outs = jax.block_until_ready(outs)

    expected = [(B, 1, 32, 32)] * 5 + [(B, 512, 4, 4)]
    assert [tuple(o.shape) for o in outs] == expected, [tuple(o.shape) for o in outs]
    assert all(bool(jnp.all(jnp.isfinite(o))) for o in outs)
    print("KERNEL_OK")
</pallas_src>

<mosaic_0001>
module attributes {stable_mosaic.version = 11 : i64} {
  func.func @_matmul_kernel(%arg0: i32, %arg1: i32, %arg2: i32, %arg3: memref<16x512xbf16, #tpu.memory_space<vmem>>, %arg4: memref<512x256xbf16, #tpu.memory_space<vmem>>, %arg5: memref<1x256xf32, #tpu.memory_space<vmem>>, %arg6: memref<1x256xf32, #tpu.memory_space<vmem>>, %arg7: memref<16x256xf32, #tpu.memory_space<vmem>>) attributes {dimension_semantics = [#tpu.dimension_semantics<parallel>, #tpu.dimension_semantics<parallel>, #tpu.dimension_semantics<arbitrary>], iteration_bounds = array<i64: 1, 2, 4>, scalar_prefetch = 0 : i64, scratch_operands = 0 : i64, tpu.core_type = #tpu.core_type<tc>, window_params = [{transform_indices = @transform_0, window_bounds = array<i64: 16, 512>}, {transform_indices = @transform_1, window_bounds = array<i64: 512, 256>}, {transform_indices = @transform_2, window_bounds = array<i64: 1, 256>}, {transform_indices = @transform_3, window_bounds = array<i64: 1, 256>}, {transform_indices = @transform_4, window_bounds = array<i64: 16, 256>}]} {
    %c0_i32 = arith.constant 0 : i32
    %0 = arith.cmpi eq, %arg2, %c0_i32 : i32
    %1 = arith.extui %0 : i1 to i32
    %c0_i32_0 = arith.constant 0 : i32
    %2 = arith.cmpi ne, %1, %c0_i32_0 : i32
    scf.if %2 {
      %cst_9 = arith.constant 0.000000e+00 : f32
      %12 = vector.broadcast %cst_9 : f32 to vector<16x256xf32>
      %c0_10 = arith.constant 0 : index
      %c0_11 = arith.constant 0 : index
      %13 = vector.load %arg7[%c0_10, %c0_11] : memref<16x256xf32, #tpu.memory_space<vmem>>, vector<16x256xf32>
      tpu.vector_store %arg7[%c0_10, %c0_11], %12 {strides = array<i32>} : memref<16x256xf32, #tpu.memory_space<vmem>>, vector<16x256xf32>,
    } else {
    }
    %c0 = arith.constant 0 : index
    %c0_1 = arith.constant 0 : index
    %3 = vector.load %arg7[%c0, %c0_1] : memref<16x256xf32, #tpu.memory_space<vmem>>, vector<16x256xf32>
    %c0_2 = arith.constant 0 : index
    %c0_3 = arith.constant 0 : index
    %4 = vector.load %arg3[%c0_2, %c0_3] : memref<16x512xbf16, #tpu.memory_space<vmem>>, vector<16x512xbf16>
    %c0_4 = arith.constant 0 : index
    %c0_5 = arith.constant 0 : index
    %5 = vector.load %arg4[%c0_4, %c0_5] : memref<512x256xbf16, #tpu.memory_space<vmem>>, vector<512x256xbf16>
    %cst = arith.constant dense<0.000000e+00> : vector<16x256xf32>
    %6 = tpu.matmul %4, %5, %cst {dimension_numbers = #tpu.dot_dimension_numbers<[1], [0], [0], [1], [0, 0, 1, 1], [], []>} : vector<16x512xbf16>, vector<512x256xbf16>, vector<16x256xf32> -> vector<16x256xf32>
    %7 = arith.addf %3, %6 : vector<16x256xf32>
    %c0_6 = arith.constant 0 : index
    %c0_7 = arith.constant 0 : index
    %8 = vector.load %arg7[%c0_6, %c0_7] : memref<16x256xf32, #tpu.memory_space<vmem>>, vector<16x256xf32>
    tpu.vector_store %arg7[%c0_6, %c0_7], %7 {strides = array<i32>} : memref<16x256xf32, #tpu.memory_space<vmem>>, vector<16x256xf32>,
    %c3_i32 = arith.constant 3 : i32
    %9 = arith.cmpi eq, %arg2, %c3_i32 : i32
    %10 = arith.extui %9 : i1 to i32
    %c0_i32_8 = arith.constant 0 : i32
    %11 = arith.cmpi ne, %10, %c0_i32_8 : i32
    scf.if %11 {
      %c0_9 = arith.constant 0 : index
      %c0_10 = arith.constant 0 : index
      %12 = vector.load %arg7[%c0_9, %c0_10] : memref<16x256xf32, #tpu.memory_space<vmem>>, vector<16x256xf32>
      %c0_11 = arith.constant 0 : index
      %c0_12 = arith.constant 0 : index
      %13 = vector.load %arg5[%c0_11, %c0_12] : memref<1x256xf32, #tpu.memory_space<vmem>>, vector<1x256xf32>
      %14 = vector.broadcast %13 : vector<1x256xf32> to vector<16x256xf32>
      %15 = arith.mulf %12, %14 : vector<16x256xf32>
      %c0_13 = arith.constant 0 : index
      %c0_14 = arith.constant 0 : index
      %16 = vector.load %arg6[%c0_13, %c0_14] : memref<1x256xf32, #tpu.memory_space<vmem>>, vector<1x256xf32>
      %17 = vector.broadcast %16 : vector<1x256xf32> to vector<16x256xf32>
      %18 = arith.addf %15, %17 : vector<16x256xf32>
      %cst_15 = arith.constant 0.000000e+00 : f32
      %19 = vector.broadcast %cst_15 : f32 to vector<16x256xf32>
      %20 = arith.maximumf %18, %19 : vector<16x256xf32>
      %c0_16 = arith.constant 0 : index
      %c0_17 = arith.constant 0 : index
      %21 = vector.load %arg7[%c0_16, %c0_17] : memref<16x256xf32, #tpu.memory_space<vmem>>, vector<16x256xf32>
      tpu.vector_store %arg7[%c0_16, %c0_17], %20 {strides = array<i32>} : memref<16x256xf32, #tpu.memory_space<vmem>>, vector<16x256xf32>,
    } else {
    }
    return
  }
  func.func @transform_0(%arg0: i32, %arg1: i32, %arg2: i32) -> (i32, i32) {
    %c0_i32 = arith.constant 0 : i32
    return %arg0, %arg2 : i32, i32
  }
  func.func @transform_1(%arg0: i32, %arg1: i32, %arg2: i32) -> (i32, i32) {
    %c0_i32 = arith.constant 0 : i32
    return %arg2, %arg1 : i32, i32
  }
  func.func @transform_2(%arg0: i32, %arg1: i32, %arg2: i32) -> (i32, i32) {
    %c0_i32 = arith.constant 0 : i32
    %c0_i32_0 = arith.constant 0 : i32
    return %c0_i32, %arg1 : i32, i32
  }
  func.func @transform_3(%arg0: i32, %arg1: i32, %arg2: i32) -> (i32, i32) {
    %c0_i32 = arith.constant 0 : i32
    %c0_i32_0 = arith.constant 0 : i32
    return %c0_i32, %arg1 : i32, i32
  }
  func.func @transform_4(%arg0: i32, %arg1: i32, %arg2: i32) -> (i32, i32) {
    %c0_i32 = arith.constant 0 : i32
    return %arg0, %arg1 : i32, i32
  }
}

</mosaic_0001>

<bundles_post_ra>
// kernel: tpu_custom_call.1
= control target key start
LH: loop header
LB: loop body
LE: loop exit
PB: predicated region body
PF: predicated region fallthrough
CT: control target
= control target key end

     0   :  { %s2223_s0 = inlined_call_operand.hbm [shape: bf16[16,2048], index: 0, kind: input, shape index: {}]   ;;  %s2224_s1 = inlined_call_operand.hbm [shape: bf16[2048,512], index: 1, kind: input, shape index: {}]   ;;  %s2225_s2 = inlined_call_operand.hbm [shape: f32[1,512], index: 2, kind: input, shape index: {}]   ;;  %s2226_s3 = inlined_call_operand.hbm [shape: f32[1,512], index: 3, kind: input, shape index: {}]   ;;  %s2227_s4 = inlined_call_operand.hbm [shape: f32[16,512], index: 4, kind: output, shape index: {}]  }
   0x1   :  { %2236 = sst [smem:[#allocation27_spill]] %s2223_s0 }
   0x2   :  { %2237 = sst [smem:[#allocation28_spill]] %s2224_s1 }
   0x3   :  { %2238 = sst [smem:[#allocation29_spill]] %s2225_s2 }
   0x4   :  { %2239 = sst [smem:[#allocation30_spill]] %s2226_s3 }
   0x5   :  { %2240 = sst [smem:[#allocation31_spill]] %s2227_s4 }
   0x6   :  { %9 = vsyncpa [#allocation3], 0 }
   0x7   :  { %11 = vsyncpa [#allocation3 + $0x1], 0 }
   0x8   :  { %12 = vsyncpa [#allocation6], 0 }
   0x9   :  { %14 = vsyncpa [#allocation6 + $0x1], 0 }
   0xa   :  { %15 = vsyncpa [#allocation9], 0 }
   0xb   :  { %17 = vsyncpa [#allocation9 + $0x1], 0 }
   0xc   :  { %18 = vsyncpa [#allocation4], 0 }
   0xd   :  { %20 = vsyncpa [#allocation4 + $0x1], 0  ;;  %s1774_s15 = smov 0   ;;  %s1776_s16 = smov 0  }
   0xe   :  { %s1778_s17 = smov 0   ;;  %s1780_s18 = smov 0  }
   0xf   :  { %s1782_s19 = smov 0   ;;  %s1784_s20 = smov 0  }
  0x10   :  { %s1786_s21 = smov 0   ;;  %s1788_s22 = smov 0  }
  0x11   :  { %s1790_s23 = smov 0   ;;  %s1792_s24 = smov 0  }
  0x12   :  { %s1794_s25 = smov 0   ;;  %s1796_s26 = smov 0  }
  0x13   :  { %s1798_s27 = smov 0   ;;  %s1800_s28 = smov 0  }
  0x14 LB: > { %2241 = sst [smem:[#allocation16_spill]] %s1681_s15  ;;  %s38_s29 = sadd.s32 1, %s1725_s26  ;;  %s1733_s28 = sphi %s1800_s28, %s26_s28   ;;  %s1729_s27 = sphi %s1798_s27, %s2293_s27   ;;  %s1725_s26 = sphi %s1796_s26, %s2283_s26   ;;  %s1721_s25 = sphi %s1794_s25, %s2292_s25   ;;  %s1717_s24 = sphi %s1792_s24, %s2281_s24   ;;  %s1713_s23 = sphi %s1790_s23, %s2280_s23   ;;  %s1709_s22 = sphi %s1788_s22, %s2291_s22   ;;  %s1705_s21 = sphi %s1786_s21, %s2290_s21   ;;  %s1701_s20 = sphi %s1784_s20, %s2289_s20   ;;  %s1697_s19 = sphi %s1782_s19, %s2288_s19   ;;  %s1693_s18 = sphi %s1780_s18, %s2287_s18   ;;  %s1689_s17 = sphi %s1778_s17, %s2286_s17   ;;  %s1685_s16 = sphi %s1776_s16, %s2285_s16   ;;  %s1681_s15 = sphi %s1774_s15, %s2277_s15  }
  0x15   : > { %2242 = sst [smem:[#allocation17_spill]] %s1685_s16  ;;  %s41_s30 = sadd.s32 1, %s1729_s27 }
  0x16   : > { %2243 = sst [smem:[#allocation18_spill]] %s1713_s23  ;;  %p39_p0 = scmp.ge.s32.totalorder %s38_s29, 4 }
  0x17   : > { %2244 = sst [smem:[#allocation19_spill]] %s1717_s24  ;;  %p62_p1 = scmp.eq.s32.totalorder %s1733_s28, 0 }
  0x18   : > { %2245 = sst [smem:[#allocation20_spill]] %s1721_s25  ;;  %s82_s5 = sadd.s32 1, %s1701_s20 }
  0x19   : > { %2246 = sst [smem:[#allocation21_spill]] %s1725_s26  ;;  %p89_p2 = scmp.ne.s32.totalorder %s1701_s20, %s1697_s19 }
  0x1a   : > { %2247 = sst [smem:[#allocation22_spill]] %s1729_s27  ;;  %s2295_s29 = smov (%p39_p0, %s38_s29), 0 }
  0x1b   : > { %2248 = sst [smem:[#allocation23_spill]] %s2295_s29  ;;  %s2297_s30 = smov (!%p39_p0, %s41_s30), %s1729_s27 }
  0x1c   : > { %s1855_s6 = ssub.s32 %s1725_s26, %s2295_s29  ;;  %p1859_p3 = por %p89_p2, %p62_p1 }
  0x1d   : > { %p43_p4 = scmp.ge.s32.totalorder %s2297_s30, 2  ;;  %p52_p5 = scmp.eq.s32.totalorder %s1855_s6, 0 }
  0x1e   : > { %p95_p6 = scmp.ne.s32.totalorder %s1697_s19, %s1693_s18  ;;  %p2232_p7 = scmp.lt.s32.totalorder %s1733_s28, 8 }
  0x1f   : > { %s2299_s30 = smov (%p43_p4, %s2297_s30), 0  ;;  %s1208_s8 = sshll.u32 %s1725_s26, 8 }
  0x20   : > { %2250 = sst [smem:[#allocation24_spill]] %s2299_s30  ;;  %s1872_s9 = ssub.s32 %s1729_s27, %s2299_s30 }
  0x21   : > { %s79_s10 = sor.u32 %s1872_s9, %s1855_s6  ;;  %s223_s11 = sand.u32 1, %s1733_s28  }
  0x22   : > { %p80_p8 = scmp.eq.s32.totalorder %s79_s10, 0  ;;  %s225_s12 = sand.u32 1, %s1701_s20  }
  0x23   : > { %s1118_s13 = sshll.u32 %s1729_s27, 1  ;;  %s1116_s29 = sshll.u32 %s225_s12, 9 }
  0x24   : > { %s1880_s14 = scalar_select %p80_p8, %s1701_s20, %s82_s5  }
  0x25   : > { %s234_s4 = sadd.s32 %s1208_s8, %s1118_s13  ;;  %s2252_s1 = sld [smem:[#allocation28_spill]] }
  0x26   : > { %2251 = sst [smem:[#allocation25_spill]] %s1880_s14  ;;  %s1120_s25 = sshll.u32 %s234_s4, 6 }
  0x27   : > { %s227_s15 = scalar_lea.vmem [#allocation5], %s1116_s29  ;;  %p1891_p9 = pnand %p2232_p7, %p1859_p3 }
  0x28   : > { %s237_s16 = sshll.u32 %s227_s15, 4  ;;  %p1127_p10 = scmp.ge.s32.totalorder %s1733_s28, 1  ;;  %s238_s16 = int_to_ptr.vmem [resolvable:$true] %s237_s16 }
  0x29   : > { %s1896_s5 = scalar_lea.sflag [#allocation6], %s223_s11  ;;  %p1467_p11 = pneg %p1891_p9 }
  0x2a   : > { %s1478_s4 = scalar_lea.vmem %s238_s16, 8192  ;;  %s1735_s3 = smov [#allocation5]  }
  0x2b   : > { %s236_s2 = scalar_lea.hbm %s2252_s1, %s1120_s25  ;;  %p1479_p12 = scmp.ne.s32.totalorder %s238_s16, %s1478_s4 }
  0x2c   : > { %s1483_s24 = sshll.u32 %s1735_s3, 4  ;;  %s1484_s24 = int_to_ptr.vmem [resolvable:$false] %s1483_s24 }
  0x2d   : > { %p1481_p13 = pnand %p1479_p12, %p1467_p11  ;;  %s1485_s15 = scalar_lea.vmem %s1484_s24, 16384 }
  0x2e   : > { %p1486_p2 = scmp.lt.s32.totalorder %s238_s16, %s1484_s24  ;;  %p1487_p4 = scmp.lt.s32.totalorder %s1485_s15, %s1478_s4 }
  0x2f   : > { %p1482_p0 = pneg %p1481_p13 }
  0x30   : > { %p1488_p3 = por %p1487_p4, %p1486_p2 }
  0x32   : > { %p1489_p8 = pnand %p1488_p3, %p1482_p0 }
  0x34   : > { %1492 = shalt.err (!%p1489_p8)
}
  0x35   : > { %s1736_s25 = smov 256   ;;  %s1737_s29 = smov 128  }
  0x36   : > { %s1738_s7 = smov 8   ;;  %p283_p11 = scmp.lt.s32.totalorder %s1733_s28, 9 }
  0x37   : > { %1229 = dma.hbm_to_vmem [thread:$0]  (!%p1891_p9), %s236_s2, 8192, %s238_s16, %s1896_s5, %s1736_s25, %s1737_s29, %s1738_s7  }
  0x38   : > { %p1907_p12 = pnand %p1127_p10, %p283_p11  ;;  %s54_s11 = sadd.s32 1, %s1713_s23 }
  0x39   : > { %p61_p13 = scmp.ne.s32.totalorder %s1713_s23, %s1709_s22  ;;  %p67_p2 = scmp.ne.s32.totalorder %s1709_s22, %s1705_s21 }
  0x3a   : > { %s1917_s12 = scalar_select %p52_p5, %s1713_s23, %s54_s11  }
  0x3b   : > { %p63_p0 = por %p62_p1, %p61_p13  ;;  %s199_s13 = sand.u32 1, %s1713_s23  }
  0x3c   : > { %2255 = sst [smem:[#allocation26_spill]] %s1917_s12  ;;  %s1113_s16 = sshll.u32 %s199_s13, 5 }
  0x3d   : > { %s2256_s0 = sld [smem:[#allocation27_spill]]  ;;  %p1931_p9 = pnand %p2232_p7, %p63_p0 }
  0x3e   : > { %s203_s24 = scalar_lea.vmem [#allocation2], %s1113_s16  ;;  %s200_s15 = scalar_lea.sflag [#allocation3], %s199_s13 }
  0x3f   : > { %s213_s6 = sshll.u32 %s203_s24, 4  ;;  %p1495_p5 = pneg %p1931_p9  ;;  %s214_s6 = int_to_ptr.vmem [resolvable:$true] %s213_s6 }
  0x40   : > { %s1506_s29 = scalar_lea.vmem %s214_s6, 512  ;;  %s1739_s7 = smov [#allocation2]  }
  0x41   : > { %p1507_p10 = scmp.ne.s32.totalorder %s214_s6, %s1506_s29  ;;  %s1511_s11 = sshll.u32 %s1739_s7, 4  ;;  %s1512_s11 = int_to_ptr.vmem [resolvable:$false] %s1511_s11 }
  0x42   : > { %p1514_p8 = scmp.lt.s32.totalorder %s214_s6, %s1512_s11 }
  0x43   : > { %s212_s2 = scalar_lea.hbm %s2256_s0, %s1208_s8  ;;  %p1509_p4 = pnand %p1507_p10, %p1495_p5 }
  0x44   : > { %s1513_s8 = scalar_lea.vmem %s1512_s11, 1024 }
  0x45   : > { %p1510_p3 = pneg %p1509_p4  ;;  %p1515_p11 = scmp.lt.s32.totalorder %s1513_s8, %s1506_s29 }
  0x47   : > { %p1516_p13 = por %p1515_p11, %p1514_p8 }
  0x49   : > { %p1517_p0 = pnand %p1516_p13, %p1510_p3 }
  0x4b   : > { %1520 = shalt.err (!%p1517_p0)
}
  0x4c   : > { %s1740_s4 = smov 1024   ;;  %s2258_s13 = sld [smem:[#allocation17_spill]] }
  0x4d   : > { %s2259_s30 = sld [smem:[#allocation16_spill]]  ;;  %s1741_s16 = smov 16  }
  0x4e   : > { %1226 = dma.hbm_to_vmem [thread:$0]  (!%p1931_p9), %s212_s2, 512, %s214_s6, %s200_s15, %s1740_s4, %s1736_s25, %s1741_s16  }
  0x4f   : > { %s1941_s24 = sadd.s32 4294967295, %s1733_s28   ;;  %s1110_s29 = sadd.s32 4294967294, %s1733_s28  }
  0x50   : > { %p68_p5 = scmp.eq.s32.totalorder %s1941_s24, 0  ;;  %p106_p10 = scmp.eq.s32.totalorder %s1872_s9, 0 }
  0x51   : > { %s108_s7 = sadd.s32 1, %s1689_s17  ;;  %p173_p11 = scmp.eq.s32.totalorder %s1941_s24, 7 }
  0x52   : > { %p1950_p4 = por %p68_p5, %p67_p2  ;;  %p1957_p3 = por %p95_p6, %p68_p5 }
  0x53   : > { %s1962_s25 = scalar_select %p106_p10, %s1689_s17, %s108_s7  }
  0x54   : > { %p115_p9 = scmp.ne.s32.totalorder %s1689_s17, %s2258_s13  ;;  %p121_p8 = scmp.ne.s32.totalorder %s2258_s13, %s2259_s30 }
  0x55   : > { %p179_p13 = scmp.eq.s32.totalorder %s1110_s29, 7  ;;  %s249_s2 = sand.u32 1, %s1689_s17  }
  0x56   : > { %p117_p0 = por %p115_p9, %p62_p1  ;;  %p1971_p7 = por %p121_p8, %p68_p5 }
  0x57   : > { %p1975_p2 = por %p173_p11, %p115_p9  ;;  %p1979_p6 = por %p179_p13, %p121_p8 }
  0x58   : > { %s1210_s6 = sshll.u32 %s1729_s27, 5  ;;  %s1121_s15 = sshll.u32 %s249_s2, 1 }
  0x59   : > { %s2264_s18 = scalar_select %p1979_p6, 1, 0 }
  0x5a   : > { %s2265_s13 = sld [smem:[#allocation29_spill]]  ;;  %p2266_p1 = scmp.lt.s32.totalorder %s1733_s28, 8 }
  0x5b   : > { %s251_s29 = scalar_lea.vmem [#allocation7], %s1121_s15  ;;  %s1742_s8 = smov [#allocation7]  }
  0x5c   : > { %p1990_p5 = pnand %p2266_p1, %p117_p0  ;;  %s259_s7 = sshll.u32 %s251_s29, 4  ;;  %s260_s7 = int_to_ptr.vmem [resolvable:$true] %s259_s7 }
  0x5d   : > { %s1534_s0 = scalar_lea.vmem %s260_s7, 32  ;;  %s1539_s4 = sshll.u32 %s1742_s8, 4  ;;  %s1540_s4 = int_to_ptr.vmem [resolvable:$false] %s1539_s4 }
  0x5e   : > { %p1523_p10 = pneg %p1990_p5  ;;  %p1535_p9 = scmp.ne.s32.totalorder %s260_s7, %s1534_s0 }
  0x5f   : > { %p1542_p13 = scmp.lt.s32.totalorder %s260_s7, %s1540_s4 }
  0x60   : > { %s257_s30 = scalar_lea.hbm %s2265_s13, %s1210_s6  ;;  %p1537_p8 = pnand %p1535_p9, %p1523_p10 }
  0x61   : > { %s1541_s13 = scalar_lea.vmem %s1540_s4, 64 }
  0x62   : > { %p1538_p11 = pneg %p1537_p8  ;;  %p1543_p0 = scmp.lt.s32.totalorder %s1541_s13, %s1534_s0 }
  0x64   : > { %p1544_p1 = por %p1543_p0, %p1542_p13 }
  0x66   : > { %p1545_p6 = pnand %p1544_p1, %p1538_p11 }
  0x68   : > { %1548 = shalt.err (!%p1545_p6)
}
  0x69   : > { %1232 = dma.hbm_to_vmem [thread:$0]  (!%p1990_p5), %s257_s30, 32, %s260_s7, %s1896_s5  }
  0x6a   : > { %s2268_s27 = sld [smem:[#allocation30_spill]]  ;;  %s270_s12 = scalar_lea.vmem [#allocation8], %s1121_s15 }
  0x6b   : > { %s278_s23 = sshll.u32 %s270_s12, 4  ;;  %s267_s8 = scalar_lea.sflag [#allocation9], %s249_s2  ;;  %s279_s23 = int_to_ptr.vmem [resolvable:$true] %s278_s23 }
  0x6c   : > { %s1562_s14 = scalar_lea.vmem %s279_s23, 32  ;;  %s1743_s0 = smov [#allocation8]  }
  0x6d   : > { %p1563_p9 = scmp.ne.s32.totalorder %s279_s23, %s1562_s14  ;;  %s1567_s4 = sshll.u32 %s1743_s0, 4  ;;  %s1568_s4 = int_to_ptr.vmem [resolvable:$false] %s1567_s4 }
  0x6e   : > { %s1569_s13 = scalar_lea.vmem %s1568_s4, 64  ;;  %p1570_p6 = scmp.lt.s32.totalorder %s279_s23, %s1568_s4 }
  0x6f   : > { %p1565_p8 = pnand %p1563_p9, %p1523_p10  ;;  %p1571_p13 = scmp.lt.s32.totalorder %s1569_s13, %s1562_s14 }
  0x70   : > { %s276_s26 = scalar_lea.hbm %s2268_s27, %s1210_s6 }
  0x71   : > { %p1566_p11 = pneg %p1565_p8  ;;  %p1572_p0 = por %p1571_p13, %p1570_p6 }
  0x73   : > { %p1573_p1 = pnand %p1572_p0, %p1566_p11 }
  0x75   : > { %1576 = shalt.err (!%p1573_p1)
}
  0x76   : > { %1235 = dma.hbm_to_vmem [thread:$0]  (!%p1990_p5), %s276_s26, 32, %s279_s23, %s267_s8  }
  0x77   : > { %287 = sbr.rel (%p1907_p12) target bundleno = 469 (0x1d5), region = 36  ;;  %s289_s1 = sand.u32 (!%p1907_p12), 1, %s1709_s22  }
  0x78   : > { %s1128_s27 = sshll.u32 (!%p1907_p12), %s289_s1, 5  ;;  %s290_s5 = scalar_lea.sflag (!%p1907_p12), [#allocation3], %s289_s1 }
  0x79   : > { %s2013_s12 = scalar_lea.vmem (!%p1907_p12), [#allocation2], %s1128_s27 }
  0x7c   : > { %1660 = dma.done.wait (%p1950_p4), %s290_s5, 512  }
  0x7d   : > { %1662 = vsyncadd (%p1950_p4), %s290_s5, 4294966784  ;;  %s298_s14 = sand.u32 1, %s1941_s24   ;;  %s300_s23 = sand.u32 1, %s1697_s19  }
  0x7e   : > { %s1129_s26 = sshll.u32 %s300_s23, 9  ;;  %s299_s10 = scalar_lea.sflag [#allocation6], %s298_s14 }
  0x7f   : > { %s2021_s2 = scalar_lea.vmem [#allocation5], %s1129_s26 }
  0x80   : > { %1664 = dma.done.wait (%p1957_p3), %s299_s10, 8192  }
  0x81   : > { %1666 = vsyncadd (%p1957_p3), %s299_s10, 4294959104  ;;  %s2269_s6 = sld [smem:[#allocation17_spill]] }
  0x87   : > { %s2028_s15 = sand.u32 1, %s2269_s6  }
  0x88   : > { %s1130_s11 = sshll.u32 %s2028_s15, 1 }
  0x89   : > { %s2031_s30 = scalar_lea.vmem [#allocation7], %s1130_s11 }
  0x8a   : > { %1668 = dma.done.wait (%p1971_p7), %s299_s10, 32  }
  0x8b   : > { %1670 = vsyncadd (%p1971_p7), %s299_s10, 4294967264  ;;  %s317_s24 = scalar_lea.sflag [#allocation9], %s2028_s15  ;;  %s2038_s16 = scalar_lea.vmem [#allocation8], %s1130_s11 }
  0x8c   : > { %1672 = dma.done.wait (%p1971_p7), %s317_s24, 32  }
  0x8d   : > { %1674 = vsyncadd (%p1971_p7), %s317_s24, 4294967264  ;;  %s1132_s3 = sshll.u32 %s2028_s15, 5  ;;  %s2270_s29 = sld [smem:[#allocation19_spill]] }
  0x8e   : > { %s2045_s7 = scalar_lea.vmem [#allocation10], %s1132_s3 }
  0x93   : > { %p1133_p12 = scmp.ne.s32.totalorder %s2270_s29, 0 }
  0x95   : > { %371 = sbr.rel (%p1133_p12) target bundleno = 157 (0x9d), region = 56 }
  0x9a   : > { %v1744_v0 = vmov 0.0  }
  0x9b   : > { %372 = vst [vmem:[%s2045_s7] sm:$0xff] %v1744_v0  ;;  %373 = vst [vmem:[%s2045_s7 + $0x8] sm:$0xff] %v1744_v0 }
  0x9c   : > { %374 = vst [vmem:[%s2045_s7 + $0x10] sm:$0xff] %v1744_v0  ;;  %375 = vst [vmem:[%s2045_s7 + $0x18] sm:$0xff] %v1744_v0 }
  0x9d PF: > { %v1363_v1 = vld [vmem:[%s2021_s2 + $0x74] ss:$8 sps:$4 sm:$0xff]   ;;  %v1367_v3 = vld [vmem:[%s2021_s2 + $0x70] ss:$8 sps:$4 sm:$0xff]   ;;  %v1369_v5 = vld [vmem:[%s2021_s2 + $0x64] ss:$8 sps:$4 sm:$0xff]  }
  0x9e   : > { %v1365_v2 = vld [vmem:[%s2021_s2 + $0x174] ss:$8 sps:$4 sm:$0xff]   ;;  %788 = vmatprep.subr.bf16.mxu0 %v1363_v1  ;;  %v1368_v4 = vld [vmem:[%s2021_s2 + $0x170] ss:$8 sps:$4 sm:$0xff]   ;;  %v1371_v6 = vld [vmem:[%s2021_s2 + $0x164] ss:$8 sps:$4 sm:$0xff]  }
  0x9f   : > { %831 = vmatprep.subr.bf16.mxu1 %v1365_v2  ;;  %789 = vmatpush1.bf16.msra.mxu0 %v1367_v3  ;;  %v1373_v7 = vld [vmem:[%s2021_s2 + $0x60] ss:$8 sps:$4 sm:$0xff]   ;;  %v1375_v9 = vld [vmem:[%s2021_s2 + $0x54] ss:$8 sps:$4 sm:$0xff]   ;;  %v1379_v11 = vld [vmem:[%s2021_s2 + $0x50] ss:$8 sps:$4 sm:$0xff]  }
  0xa0   : > { %832 = vmatpush1.bf16.msra.mxu1 %v1368_v4  ;;  %790 = vmatprep.subr.bf16.mxu0 %v1369_v5  ;;  %v1374_v8 = vld [vmem:[%s2021_s2 + $0x160] ss:$8 sps:$4 sm:$0xff]   ;;  %v1377_v10 = vld [vmem:[%s2021_s2 + $0x154] ss:$8 sps:$4 sm:$0xff]   ;;  %v1380_v12 = vld [vmem:[%s2021_s2 + $0x150] ss:$8 sps:$4 sm:$0xff]  }
  0xa1   : > { %833 = vmatprep.subr.bf16.mxu1 %v1371_v6  ;;  %v1381_v13 = vld [vmem:[%s2021_s2 + $0x44] ss:$8 sps:$4 sm:$0xff]   ;;  %v1385_v15 = vld [vmem:[%s2021_s2 + $0x40] ss:$8 sps:$4 sm:$0xff]   ;;  %v1387_v17 = vld [vmem:[%s2021_s2 + $0x34] ss:$8 sps:$4 sm:$0xff]  }
  0xa2   : > { %v1383_v14 = vld [vmem:[%s2021_s2 + $0x144] ss:$8 sps:$4 sm:$0xff]   ;;  %v1386_v16 = vld [vmem:[%s2021_s2 + $0x140] ss:$8 sps:$4 sm:$0xff]   ;;  %v1389_v18 = vld [vmem:[%s2021_s2 + $0x134] ss:$8 sps:$4 sm:$0xff]  }
  0xa3   : > { %791 = vmatpush1.bf16.msra.mxu0 %v1373_v7  ;;  %v1391_v19 = vld [vmem:[%s2021_s2 + $0x30] ss:$8 sps:$4 sm:$0xff]   ;;  %v1393_v21 = vld [vmem:[%s2021_s2 + $0x24] ss:$8 sps:$4 sm:$0xff]   ;;  %v1397_v23 = vld [vmem:[%s2021_s2 + $0x20] ss:$8 sps:$4 sm:$0xff]  }
  0xa4   : > { %834 = vmatpush1.bf16.msra.mxu1 %v1374_v8  ;;  %792 = vmatprep.subr.bf16.mxu0 %v1375_v9  ;;  %v1392_v20 = vld [vmem:[%s2021_s2 + $0x130] ss:$8 sps:$4 sm:$0xff]   ;;  %v1395_v22 = vld [vmem:[%s2021_s2 + $0x124] ss:$8 sps:$4 sm:$0xff]   ;;  %v1398_v24 = vld [vmem:[%s2021_s2 + $0x120] ss:$8 sps:$4 sm:$0xff]  }
  0xa5   : > { %835 = vmatprep.subr.bf16.mxu1 %v1377_v10  ;;  %v1399_v25 = vld [vmem:[%s2021_s2 + $0x14] ss:$8 sps:$4 sm:$0xff]   ;;  %v1403_v27 = vld [vmem:[%s2021_s2 + $0x10] ss:$8 sps:$4 sm:$0xff]   ;;  %v1405_v29 = vld [vmem:[%s2021_s2 + $0x4] ss:$8 sps:$4 sm:$0xff]  }
  0xa6   : > { %v1401_v26 = vld [vmem:[%s2021_s2 + $0x114] ss:$8 sps:$4 sm:$0xff]   ;;  %v1404_v28 = vld [vmem:[%s2021_s2 + $0x110] ss:$8 sps:$4 sm:$0xff]   ;;  %v1407_v30 = vld [vmem:[%s2021_s2 + $0x104] ss:$8 sps:$4 sm:$0xff]  }
  0xa7   : > { %793 = vmatpush1.bf16.msra.mxu0 %v1379_v11  ;;  %v1409_v31 = vld [vmem:[%s2021_s2] ss:$8 sps:$4 sm:$0xff]   ;;  %v1411_v33 = vld [vmem:[%s2021_s2 + $0xf4] ss:$8 sps:$4 sm:$0xff]   ;;  %v1415_v35 = vld [vmem:[%s2021_s2 + $0xf0] ss:$8 sps:$4 sm:$0xff]  }
  0xa8   : > { %836 = vmatpush1.bf16.msra.mxu1 %v1380_v12  ;;  %794 = vmatprep.subr.bf16.mxu0 %v1381_v13  ;;  %v1410_v32 = vld [vmem:[%s2021_s2 + $0x100] ss:$8 sps:$4 sm:$0xff]   ;;  %v1413_v34 = vld [vmem:[%s2021_s2 + $0x1f4] ss:$8 sps:$4 sm:$0xff]   ;;  %v1416_v36 = vld [vmem:[%s2021_s2 + $0x1f0] ss:$8 sps:$4 sm:$0xff]  }
  0xa9   : > { %837 = vmatprep.subr.bf16.mxu1 %v1383_v14  ;;  %v1417_v37 = vld [vmem:[%s2021_s2 + $0xe4] ss:$8 sps:$4 sm:$0xff]   ;;  %v1421_v39 = vld [vmem:[%s2021_s2 + $0xe0] ss:$8 sps:$4 sm:$0xff]   ;;  %v1423_v41 = vld [vmem:[%s2021_s2 + $0xd4] ss:$8 sps:$4 sm:$0xff]  }
  0xaa   : > { %v1419_v38 = vld [vmem:[%s2021_s2 + $0x1e4] ss:$8 sps:$4 sm:$0xff]   ;;  %v1422_v40 = vld [vmem:[%s2021_s2 + $0x1e0] ss:$8 sps:$4 sm:$0xff]   ;;  %v1425_v42 = vld [vmem:[%s2021_s2 + $0x1d4] ss:$8 sps:$4 sm:$0xff]  }
  0xab   : > { %795 = vmatpush1.bf16.msra.mxu0 %v1385_v15  ;;  %v1427_v43 = vld [vmem:[%s2021_s2 + $0xd0] ss:$8 sps:$4 sm:$0xff]   ;;  %v1429_v45 = vld [vmem:[%s2021_s2 + $0xc4] ss:$8 sps:$4 sm:$0xff]   ;;  %v1433_v47 = vld [vmem:[%s2021_s2 + $0xc0] ss:$8 sps:$4 sm:$0xff]  }
  0xac   : > { %838 = vmatpush1.bf16.msra.mxu1 %v1386_v16  ;;  %796 = vmatprep.subr.bf16.mxu0 %v1387_v17  ;;  %v1428_v44 = vld [vmem:[%s2021_s2 + $0x1d0] ss:$8 sps:$4 sm:$0xff]   ;;  %v1431_v46 = vld [vmem:[%s2021_s2 + $0x1c4] ss:$8 sps:$4 sm:$0xff]   ;;  %v1434_v49 = vld [vmem:[%s2021_s2 + $0x1c0] ss:$8 sps:$4 sm:$0xff]  }
  0xad   : > { %839 = vmatprep.subr.bf16.mxu1 %v1389_v18  ;;  %v1461_v48 = vld [vmem:[%s2013_s12 + $0x4] ss:$16 sps:$4 sm:$0xff]   ;;  %v1464_v52 = vld [vmem:[%s2013_s12 + $0xc] ss:$16 sps:$4 sm:$0xff]   ;;  %v1439_v53 = vld [vmem:[%s2021_s2 + $0xb0] ss:$8 sps:$4 sm:$0xff]  }
  0xae   : > { %v1435_v50 = vld [vmem:[%s2021_s2 + $0xb4] ss:$8 sps:$4 sm:$0xff]   ;;  %820 = vmatprep.mubr.bf16.mxu0 %v1461_v48  ;;  %863 = vmatprep.mubr.bf16.mxu1 %v1464_v52  ;;  %v1440_v54 = vld [vmem:[%s2021_s2 + $0x1b0] ss:$8 sps:$4 sm:$0xff]   ;;  %v1441_v55 = vld [vmem:[%s2021_s2 + $0xa4] ss:$8 sps:$4 sm:$0xff]  }
  0xaf   : > { %797 = vmatpush1.bf16.msra.mxu0 %v1391_v19  ;;  %v1437_v51 = vld [vmem:[%s2021_s2 + $0x1b4] ss:$8 sps:$4 sm:$0xff]   ;;  %v1443_v56 = vld [vmem:[%s2021_s2 + $0x1a4] ss:$8 sps:$4 sm:$0xff]   ;;  %v1445_v57 = vld [vmem:[%s2021_s2 + $0xa0] ss:$8 sps:$4 sm:$0xff]  }
  0xb0   : > { %840 = vmatpush1.bf16.msra.mxu1 %v1392_v20  ;;  %798 = vmatprep.subr.bf16.mxu0 %v1393_v21  ;;  %v1446_v58 = vld [vmem:[%s2021_s2 + $0x1a0] ss:$8 sps:$4 sm:$0xff]   ;;  %v1447_v59 = vld [vmem:[%s2021_s2 + $0x94] ss:$8 sps:$4 sm:$0xff]   ;;  %v1451_v61 = vld [vmem:[%s2021_s2 + $0x90] ss:$8 sps:$4 sm:$0xff]  }
  0xb1   : > { %841 = vmatprep.subr.bf16.mxu1 %v1395_v22  ;;  %v1449_v60 = vld [vmem:[%s2021_s2 + $0x194] ss:$8 sps:$4 sm:$0xff]   ;;  %v1452_v62 = vld [vmem:[%s2021_s2 + $0x190] ss:$8 sps:$4 sm:$0xff]   ;;  %v1453_v63 = vld [vmem:[%s2021_s2 + $0x84] ss:$8 sps:$4 sm:$0xff]  }
  0xb2   : > { %v1455_v0 = vld [vmem:[%s2021_s2 + $0x184] ss:$8 sps:$4 sm:$0xff]   ;;  %v1457_v1 = vld [vmem:[%s2021_s2 + $0x80] ss:$8 sps:$4 sm:$0xff]   ;;  %v377_v10 = vld [vmem:[%s2045_s7 + $0x8] sm:$0xff]  ;;  %s2271_s21 = sld [smem:[#allocation19_spill]] }
  0xb3   : > { %799 = vmatpush1.bf16.msra.mxu0 %v1397_v23  ;;  %v1458_v2 = vld [vmem:[%s2021_s2 + $0x180] ss:$8 sps:$4 sm:$0xff]   ;;  %v378_v15 = vld [vmem:[%s2045_s7 + $0x10] sm:$0xff] }
  0xb4   : > { %842 = vmatpush1.bf16.msra.mxu1 %v1398_v24  ;;  %800 = vmatprep.subr.bf16.mxu0 %v1399_v25  ;;  %v1459_v3 = vld [vmem:[%s2013_s12] ss:$16 sps:$4 sm:$0xff]   ;;  %v1462_v4 = vld [vmem:[%s2013_s12 + $0x8] ss:$16 sps:$4 sm:$0xff]  }
  0xb5   : > { %843 = vmatprep.subr.bf16.mxu1 %v1401_v26  ;;  %v376_v6 = vld [vmem:[%s2045_s7] sm:$0xff]  ;;  %v379_v20 = vld [vmem:[%s2045_s7 + $0x18] sm:$0xff] }
  0xb7   : > { %801 = vmatpush1.bf16.msra.mxu0 %v1403_v27 }
  0xb8   : > { %844 = vmatpush1.bf16.msra.mxu1 %v1404_v28  ;;  %802 = vmatprep.subr.bf16.mxu0 %v1405_v29  ;;  %p1202_p7 = scmp.ne.s32.totalorder %s2271_s21, 3 }
  0xb9   : > { %845 = vmatprep.subr.bf16.mxu1 %v1407_v30 }
  0xbb   : > { %803 = vmatpush1.bf16.msra.mxu0 %v1409_v31 }
  0xbc   : > { %846 = vmatpush1.bf16.msra.mxu1 %v1410_v32  ;;  %804 = vmatprep.subr.bf16.mxu0 %v1411_v33 }
  0xbd   : > { %847 = vmatprep.subr.bf16.mxu1 %v1413_v34 }
  0xbf   : > { %805 = vmatpush2.bf16.msra.mxu0 %v1415_v35 }
  0xc0   : > { %848 = vmatpush2.bf16.msra.mxu1 %v1416_v36  ;;  %806 = vmatprep.subr.bf16.mxu0 %v1417_v37 }
  0xc1   : > { %849 = vmatprep.subr.bf16.mxu1 %v1419_v38 }
  0xc3   : > { %807 = vmatpush2.bf16.msra.mxu0 %v1421_v39 }
  0xc4   : > { %850 = vmatpush2.bf16.msra.mxu1 %v1422_v40  ;;  %808 = vmatprep.subr.bf16.mxu0 %v1423_v41 }
  0xc5   : > { %851 = vmatprep.subr.bf16.mxu1 %v1425_v42 }
  0xc7   : > { %809 = vmatpush2.bf16.msra.mxu0 %v1427_v43 }
  0xc8   : > { %852 = vmatpush2.bf16.msra.mxu1 %v1428_v44  ;;  %810 = vmatprep.subr.bf16.mxu0 %v1429_v45 }
  0xc9   : > { %853 = vmatprep.subr.bf16.mxu1 %v1431_v46 }
  0xcb   : > { %811 = vmatpush2.bf16.msra.mxu0 %v1433_v47 }
  0xcc   : > { %854 = vmatpush2.bf16.msra.mxu1 %v1434_v49  ;;  %812 = vmatprep.subr.bf16.mxu0 %v1435_v50 }
  0xcd   : > { %855 = vmatprep.subr.bf16.mxu1 %v1437_v51 }
  0xcf   : > { %813 = vmatpush2.bf16.msra.mxu0 %v1439_v53 }
  0xd0   : > { %856 = vmatpush2.bf16.msra.mxu1 %v1440_v54  ;;  %814 = vmatprep.subr.bf16.mxu0 %v1441_v55 }
  0xd1   : > { %857 = vmatprep.subr.bf16.mxu1 %v1443_v56 }
  0xd3   : > { %815 = vmatpush2.bf16.msra.mxu0 %v1445_v57 }
  0xd4   : > { %858 = vmatpush2.bf16.msra.mxu1 %v1446_v58  ;;  %816 = vmatprep.subr.bf16.mxu0 %v1447_v59 }
  0xd5   : > { %859 = vmatprep.subr.bf16.mxu1 %v1449_v60 }
  0xd7   : > { %817 = vmatpush2.bf16.msra.mxu0 %v1451_v61 }
  0xd8   : > { %860 = vmatpush2.bf16.msra.mxu1 %v1452_v62  ;;  %818 = vmatprep.subr.bf16.mxu0 %v1453_v63 }
  0xd9   : > { %861 = vmatprep.subr.bf16.mxu1 %v1455_v0 }
  0xdb   : > { %819 = vmatpush2.bf16.msra.mxu0 %v1457_v1 }
  0xdc   : > { %862 = vmatpush2.bf16.msra.mxu1 %v1458_v2 }
  0xde   : > { %821 = vmatmul.mubr.bf16.vlgmr.msra.gmra.mxu0 %v1459_v3 }
  0xdf   : > { %864 = vmatmul.mubr.bf16.vlgmr.msra.gmra.mxu1 %v1462_v4 }
 0x19e   : > { %v822_v5 = vpop.f32.mrf.mxu0 }
 0x19f   : > { %v865_v7 = vpop.f32.mrf.mxu1 }
 0x1a0   : > { %v866_v8 = vadd.f32 %v865_v7, %v822_v5  ;;  %v824_v9 = vpop.f32.mrf.mxu0 }
 0x1a1   : > { %v867_v11 = vpop.f32.mrf.mxu1 }
 0x1a2   : > { %v874_v12 = vadd.f32 %v866_v8, %v376_v6  ;;  %v868_v13 = vadd.f32 %v867_v11, %v824_v9  ;;  %v826_v14 = vpop.f32.mrf.mxu0 }
 0x1a3   : > { %v869_v16 = vpop.f32.mrf.mxu1 }
 0x1a4   : > { %878 = vst [vmem:[%s2045_s7] sm:$0xff] %v874_v12  ;;  %v875_v17 = vadd.f32 %v868_v13, %v377_v10  ;;  %v870_v18 = vadd.f32 %v869_v16, %v826_v14  ;;  %v828_v19 = vpop.f32.mrf.mxu0 }
 0x1a5   : > { %v871_v21 = vpop.f32.mrf.mxu1 }
 0x1a6   : > { %879 = vst [vmem:[%s2045_s7 + $0x8] sm:$0xff] %v875_v17  ;;  %v876_v22 = vadd.f32 %v870_v18, %v378_v15  ;;  %v872_v23 = vadd.f32 %v871_v21, %v828_v19  ;;  %885 = sbr.rel (%p1202_p7) target bundleno = 443 (0x1bb), region = 60 }
 0x1a8   : > { %880 = vst [vmem:[%s2045_s7 + $0x10] sm:$0xff] %v876_v22  ;;  %v877_v24 = vadd.f32 %v872_v23, %v379_v20 }
 0x1aa   : > { %881 = vst [vmem:[%s2045_s7 + $0x18] sm:$0xff] %v877_v24 }
 0x1ab   : > { %v892_v25 = vlaneseq  ;;  %v890_v27 = vld [vmem:[%s2031_s30] sm:$0x3]  ;;  %v906_v28 = vld [vmem:[%s2038_s16] sm:$0x3]  ;;  %v886_v29 = vld [vmem:[%s2045_s7] sm:$0xff] }
 0x1ad   : > { %v893_v26 = vshrl.u32 %v892_v25, 7  ;;  %v887_v32 = vld [vmem:[%s2045_s7 + $0x8] sm:$0xff] }
 0x1af   : > { %v894_v30 = vsub.s32 0, %v893_v26  ;;  %v898_v31 = vsub.s32 1, %v893_v26  ;;  %v888_v33 = vld [vmem:[%s2045_s7 + $0x10] sm:$0xff] }
 0x1b1   : > { %v889_v34 = vld [vmem:[%s2045_s7 + $0x18] sm:$0xff]  ;;  %v895_v35 = vrot.slane %v890_v27, %v894_v30  ;;  %v911_v36 = vrot.slane %v906_v28, %v894_v30  ;;  %v899_v37 = vrot.slane %v890_v27, %v898_v31  ;;  %v915_v38 = vrot.slane %v906_v28, %v898_v31 }
 0x1b3   : > { %v902_v39 = vmul.f32 %v895_v35, %v886_v29  ;;  %v903_v40 = vmul.f32 %v899_v37, %v887_v32  ;;  %v904_v41 = vmul.f32 %v895_v35, %v888_v33  ;;  %v905_v42 = vmul.f32 %v899_v37, %v889_v34 }
 0x1b5   : > { %v918_v43 = vadd.f32 %v911_v36, %v902_v39  ;;  %v919_v44 = vadd.f32 %v915_v38, %v903_v40  ;;  %v920_v45 = vadd.f32 %v911_v36, %v904_v41  ;;  %v921_v46 = vadd.f32 %v915_v38, %v905_v42 }
 0x1b7   : > { %v922_v47 = vmax.f32 %v918_v43, 0.0  ;;  %v923_v48 = vmax.f32 %v919_v44, 0.0  ;;  %v924_v49 = vmax.f32 %v920_v45, 0.0  ;;  %v925_v50 = vmax.f32 %v921_v46, 0.0 }
 0x1b9   : > { %926 = vst [vmem:[%s2045_s7] sm:$0xff] %v922_v47  ;;  %927 = vst [vmem:[%s2045_s7 + $0x8] sm:$0xff] %v923_v48 }
 0x1ba   : > { %928 = vst [vmem:[%s2045_s7 + $0x10] sm:$0xff] %v924_v49  ;;  %929 = vst [vmem:[%s2045_s7 + $0x18] sm:$0xff] %v925_v50 }
 0x1bb PF: > { %s2272_s8 = sld [smem:[#allocation20_spill]]  ;;  %s947_s5 = sshll.u32 %s2045_s7, 4  ;;  %s2146_s5 = int_to_ptr.vmem [resolvable:$true] %s947_s5 }
 0x1bc   : > { %s2273_s1 = sld [smem:[#allocation31_spill]]  ;;  %s931_s12 = scalar_lea.sflag [#allocation4], %s2028_s15 }
 0x1bd   : > { %s1577_s14 = scalar_lea.vmem %s2146_s5, 512  ;;  %s1745_s23 = smov [#allocation10]  }
 0x1be   : > { %p1578_p4 = scmp.ne.s32.totalorder %s2146_s5, %s1577_s14  ;;  %s1581_s26 = sshll.u32 %s1745_s23, 4  ;;  %s1582_s26 = int_to_ptr.vmem [resolvable:$false] %s1581_s26 }
 0x1bf   : > { %s1583_s10 = scalar_lea.vmem %s1582_s26, 1024  ;;  %p1584_p10 = scmp.lt.s32.totalorder %s2146_s5, %s1582_s26 }
 0x1c0   : > { %p1579_p3 = pnand %p1578_p4, %p1975_p2  ;;  %p1585_p9 = scmp.lt.s32.totalorder %s1583_s10, %s1577_s14 }
 0x1c1   : > { %s1212_s0 = sshll.u32 %s2272_s8, 8 }
 0x1c2   : > { %s2143_s27 = scalar_lea.hbm %s2273_s1, %s1212_s0  ;;  %p1580_p5 = pneg %p1579_p3 }
 0x1c3   : > { %p1586_p8 = por %p1585_p9, %p1584_p10 }
 0x1c5   : > { %p1587_p11 = pnand %p1586_p8, %p1580_p5 }
 0x1c7   : > { %1590 = shalt.err (!%p1587_p11)
}
 0x1c8   : > { %s1591_s2 = scalar_lea.hbm %s2143_s27, 512  ;;  %s1595_s30 = scalar_lea.hbm %s2273_s1, 1024 }
 0x1c9   : > { %p1592_p6 = scmp.ne.s32.totalorder %s2143_s27, %s1591_s2  ;;  %p1596_p1 = scmp.lt.s32.totalorder %s2143_s27, %s2273_s1 }
 0x1ca   : > { %p1597_p12 = scmp.lt.s32.totalorder %s1595_s30, %s1591_s2 }
 0x1cb   : > { %p1593_p13 = pnand %p1592_p6, %p1975_p2 }
 0x1cc   : > { %p1598_p7 = por %p1597_p12, %p1596_p1 }
 0x1cd   : > { %p1594_p0 = pneg %p1593_p13 }
 0x1cf   : > { %p1599_p4 = pnand %p1598_p7, %p1594_p0 }
 0x1d1   : > { %1602 = shalt.err (!%p1599_p4)
}
 0x1d2   : > { %s1746_s3 = smov 256   ;;  %s1747_s7 = smov 512  }
 0x1d3   : > { %s1748_s29 = smov 16  }
 0x1d4   : > { %1221 = dma.vmem_to_hbm [thread:$0]  (%p1975_p2), %s2146_s5, 512, %s2143_s27, %s931_s12, %s1746_s3, %s1747_s7, %s1748_s29  }
 0x1d5 PF: > { %s2274_s21 = sld [smem:[#allocation16_spill]]  ;;  %p1241_p3 = scmp.ge.s32.totalorder %s1733_s28, 2 }
 0x1d6   : > { %p2275_p5 = scmp.ne.s32.totalorder %s2264_s18, 0 }
 0x1d8   : > { %p1237_p10 = pnand %p1241_p3, %p2275_p5 }
 0x1da   : > { %p1238_p9 = pneg %p1237_p10 }
 0x1db   : > { %s962_s8 = sand.u32 1, %s2274_s21  }
 0x1dc   : > { %s963_s0 = scalar_lea.sflag [#allocation4], %s962_s8 }
 0x1dd   : > { %1676 = dma.done.wait (%p1238_p9), %s963_s0, 512  }
 0x1de   : > { %1678 = vsyncadd (%p1238_p9), %s963_s0, 4294966784  ;;  %s26_s28 = sadd.s32 1, %s1733_s28   ;;  %s2277_s15 = sld [smem:[#allocation17_spill]] }
 0x1df   : > { %p2176_p8 = scmp.ge.s32.totalorder %s26_s28, 10   ;;  %s2278_s9 = sld [smem:[#allocation25_spill]] }
 0x1e0   : > { %s2279_s13 = sld [smem:[#allocation18_spill]]  ;;  %s2285_s16 = smov %s1689_s17 }
 0x1e1   : > { %s2280_s23 = sld [smem:[#allocation26_spill]]  ;;  %s2286_s17 = smov %s1962_s25 }
 0x1e2   : > { %s2281_s24 = sld [smem:[#allocation21_spill]]  ;;  %s2287_s18 = smov %s1697_s19 }
 0x1e3   : > { %s2282_s27 = sld [smem:[#allocation22_spill]]  ;;  %s2288_s19 = smov %s1701_s20 }
 0x1e4   : > { %s2283_s26 = sld [smem:[#allocation23_spill]]  ;;  %s2290_s21 = smov %s1709_s22 }
 0x1e5   : > { %s2284_s5 = sld [smem:[#allocation24_spill]]  ;;  %s2289_s20 = smov %s2278_s9 }
 0x1e6   : > { %s2291_s22 = smov %s2279_s13 }
 0x1e7   :  { %25 = sbr.rel (!%p2176_p8) target bundleno = 20 (0x14), region = 126 }
 0x1e9   : > { %s2292_s25 = smov %s2282_s27 }
 0x1eb   : > { %s2293_s27 = smov %s2284_s5 }
 0x1ec   :  { %968 = vsyncpa [#allocation3], 1 }
 0x1ed   :  { %970 = vsyncpa [#allocation3 + $0x1], 1 }
 0x1ee   :  { %971 = vsyncpa [#allocation6], 1 }
 0x1ef   :  { %973 = vsyncpa [#allocation6 + $0x1], 1 }
 0x1f0   :  { %974 = vsyncpa [#allocation9], 1 }
 0x1f1   :  { %976 = vsyncpa [#allocation9 + $0x1], 1 }
 0x1f2   :  { %977 = vsyncpa [#allocation4], 1 }
 0x1f3   :  { %979 = vsyncpa [#allocation4 + $0x1], 1 }

</bundles_post_ra>
